<compile_context>
chip_gen: v5e
topology: v5e:2x2
jax: 0.10.0
libtpu: 0.0.40
codegen_flags: <defaults>
</compile_context>

<pallas_src>
import functools

import jax
import jax.numpy as jnp
from jax import lax
from jax.experimental import pallas as pl
from jax.experimental.pallas import tpu as pltpu

_EPS = 1e-6


def _pick_query_tile(bs):
    for t in (256, 128, 64, 32, 16, 8):
        if bs % t == 0:
            return t
    return bs


def _info_nce_kernel(f_ref, n_ref, out_ref, keys_ref, *, bs, tq, eps):
    """One query-row tile per grid step.

    f_ref, n_ref : (bs, D) full-array VMEM blocks (resident across the grid).
    out_ref      : (1, 1) fp32 resident accumulator (mean loss).
    keys_ref     : (2*bs, D) bf16 scratch = row-normalized [noise; f].
    """
    i = pl.program_id(0)
    eps2 = eps * eps
    inv_bs = 1.0 / bs

    @pl.when(i == 0)
    def _init():
        # Normalize ALL keys once into bf16 scratch (resident for every tile).
        # nn.CosineSimilarity: row / max(||row||, eps) == row * rsqrt(max(||row||^2, eps^2)).
        n32 = n_ref[...].astype(jnp.float32)
        n_inv = lax.rsqrt(jnp.maximum(jnp.sum(n32 * n32, axis=1, keepdims=True), eps2))
        keys_ref[pl.ds(0, bs), :] = (n32 * n_inv).astype(jnp.bfloat16)
        f32 = f_ref[...].astype(jnp.float32)
        f_inv = lax.rsqrt(jnp.maximum(jnp.sum(f32 * f32, axis=1, keepdims=True), eps2))
        keys_ref[pl.ds(bs, bs), :] = (f32 * f_inv).astype(jnp.bfloat16)
        out_ref[...] = jnp.zeros_like(out_ref)

    # --- per-tile row-wise diagonal terms (full fp32, no (bs,bs) masks) ------
    q0 = pl.multiple_of(i * tq, tq)
    f_t = f_ref[pl.ds(q0, tq), :].astype(jnp.float32)           # (tq, D)
    n_t = n_ref[pl.ds(q0, tq), :].astype(jnp.float32)           # (tq, D)
    ss_f = jnp.sum(f_t * f_t, axis=1, keepdims=True)            # (tq, 1)
    ss_n = jnp.sum(n_t * n_t, axis=1, keepdims=True)
    inv_f = lax.rsqrt(jnp.maximum(ss_f, eps2))
    inv_n = lax.rsqrt(jnp.maximum(ss_n, eps2))
    cos_pos = jnp.sum(f_t * n_t, axis=1, keepdims=True) * inv_f * inv_n   # (tq, 1)
    cos_self = ss_f * inv_f * inv_f                              # == 1 for non-degenerate rows
    diag = jnp.exp(cos_pos) + jnp.exp(cos_self)                  # (tq, 1)

    # --- one fused lane-dense (tq, 2*bs) bf16 MXU matmul over all keys -------
    q_n = keys_ref[pl.ds(bs + q0, tq), :]                        # bf16 (tq, D)
    sims = lax.dot_general(q_n, keys_ref[...],
                           (((1,), (1,)), ((), ())),             # contract feature axes
                           preferred_element_type=jnp.float32)   # (tq, 2*bs) fp32
    row_sum = jnp.sum(jnp.exp(sims), axis=1, keepdims=True)      # (tq, 1)
    neg = row_sum - diag

    # -log(pos / (neg + eps)) == log(neg + eps) - cos_pos   (since pos = exp(cos_pos))
    loss_rows = jnp.log(neg + eps) - cos_pos                     # (tq, 1)
    out_ref[...] += jnp.sum(loss_rows, axis=0, keepdims=True) * inv_bs


def info_nce_loss(f, noise):
    """Equivalent of InfoNCELoss.forward(f, noise). Returns a float32 scalar."""
    assert f.ndim == 2 and f.shape == noise.shape, "f/noise must be (bs, D) with equal shapes"
    bs, d = f.shape
    tq = _pick_query_tile(bs)
    nsteps = bs // tq

    # Rough VMEM budget: resident input blocks + bf16 key scratch + fp32
    # per-tile temporaries; generous floor, capped under v7x's 64 MiB physical.
    itemsize = jnp.dtype(f.dtype).itemsize
    need = (2 * 2 * bs * d * itemsize          # two resident input blocks (+buffering slack)
            + 2 * bs * d * 2                   # bf16 key scratch
            + 2 * 2 * bs * d * 4               # fp32 temporaries during init
            + 6 * tq * max(2 * bs, 256) * 4    # (tq, 2bs) matmul/exp temporaries
            + (2 << 20))
    vmem_limit = int(min(max(need, 24 << 20), 96 << 20))
    # TODO(synk): if `need` exceeds VMEM (64 MiB physical on v7x), add key-row /
    # feature-dim grid axes (flash-style running row sums) instead of resident keys.

    kernel = functools.partial(_info_nce_kernel, bs=bs, tq=tq, eps=_EPS)

    out = pl.pallas_call(
        kernel,
        out_shape=jax.ShapeDtypeStruct((1, 1), jnp.float32),
        grid_spec=pltpu.PrefetchScalarGridSpec(
            num_scalar_prefetch=0,
            grid=(nsteps,),
            in_specs=[
                # Full-array blocks (exempt from the (8,128) rule); constant
                # index map -> each input DMA'd from HBM exactly once, then resident.
                pl.BlockSpec((bs, d), lambda i: (0, 0)),
                pl.BlockSpec((bs, d), lambda i: (0, 0)),
            ],
            out_specs=pl.BlockSpec((1, 1), lambda i: (0, 0)),
            scratch_shapes=[pltpu.VMEM((2 * bs, d), jnp.bfloat16)],
        ),
        compiler_params=pltpu.CompilerParams(
            # Sequential query-tile axis: step 0 builds the key scratch and the
            # scalar output accumulates across steps.
            # TODO(synk): a megacore-parallel row split would need per-core key prep.
            dimension_semantics=("arbitrary",),
            vmem_limit_bytes=vmem_limit,
        ),
    )(f, noise)
    return out[0, 0]


def _info_nce_ref(f, noise, eps=_EPS):
    """Pure-JAX reference mirroring the PyTorch module."""
    f = f.astype(jnp.float32)
    noise = noise.astype(jnp.float32)
    bs = f.shape[0]
    cat = jnp.concatenate([noise, f], axis=0)                       # (2bs, D)
    f_n = f / jnp.maximum(jnp.linalg.norm(f, axis=1, keepdims=True), eps)
    c_n = cat / jnp.maximum(jnp.linalg.norm(cat, axis=1, keepdims=True), eps)
    matrix = jnp.exp(f_n @ c_n.T)                                   # (bs, 2bs)
    pos = jnp.diagonal(matrix[:, :bs])                              # matrix[i, i]
    self_sim = jnp.diagonal(matrix[:, bs:])                         # matrix[i, i+bs]
    neg = matrix.sum(axis=1) - pos - self_sim
    return (-jnp.log(pos / (neg + eps))).mean()


if __name__ == "__main__":
    key = jax.random.PRNGKey(0)
    k_f, k_n = jax.random.split(key)
    bs, hidden = 8, 32
    f = jax.random.normal(k_f, (bs, hidden), dtype=jnp.float32)
    # Correlated "noise" so positives are meaningfully closer than negatives.
    noise = 0.8 * f + 0.2 * jax.random.normal(k_n, (bs, hidden), dtype=jnp.float32)

    result = jax.block_until_ready(info_nce_loss(f, noise))
    expected = jax.block_until_ready(_info_nce_ref(f, noise))

    assert result.shape == () and result.dtype == jnp.float32
    # bf16 MXU operands (fp32 accumulation) -> small tolerance vs. the fp32 reference.
    assert jnp.allclose(result, expected, rtol=2e-2, atol=2e-2), (
        f"mismatch: kernel={result}, ref={expected}"
    )
    print("KERNEL_OK")
</pallas_src>

<mosaic_0001>
module attributes {stable_mosaic.version = 11 : i64} {
  func.func @_info_nce_kernel(%arg0: i32, %arg1: memref<8x32xf32, #tpu.memory_space<vmem>>, %arg2: memref<8x32xf32, #tpu.memory_space<vmem>>, %arg3: memref<1x1xf32, #tpu.memory_space<vmem>>, %arg4: memref<16x32xbf16, #tpu.memory_space<vmem>>) attributes {dimension_semantics = [#tpu.dimension_semantics<arbitrary>], iteration_bounds = array<i64: 1>, scalar_prefetch = 0 : i64, scratch_operands = 1 : i64, tpu.core_type = #tpu.core_type<tc>, window_params = [{pipeline_mode = #tpu.pipeline_mode<synchronous>, transform_indices = @transform_0, window_bounds = array<i64: 8, 32>}, {pipeline_mode = #tpu.pipeline_mode<synchronous>, transform_indices = @transform_1, window_bounds = array<i64: 8, 32>}, {pipeline_mode = #tpu.pipeline_mode<synchronous>, transform_indices = @transform_2, window_bounds = array<i64: 1, 1>}]} {
    %c0_i32 = arith.constant 0 : i32
    %0 = arith.cmpi eq, %arg0, %c0_i32 : i32
    %1 = arith.extui %0 : i1 to i32
    %c0_i32_0 = arith.constant 0 : i32
    %2 = arith.cmpi ne, %1, %c0_i32_0 : i32
    scf.if %2 {
      %c0_19 = arith.constant 0 : index
      %c0_20 = arith.constant 0 : index
      %51 = vector.load %arg2[%c0_19, %c0_20] : memref<8x32xf32, #tpu.memory_space<vmem>>, vector<8x32xf32>
      %52 = arith.mulf %51, %51 : vector<8x32xf32>
      %cst_21 = arith.constant dense<0.000000e+00> : vector<8xf32>
      %53 = vector.multi_reduction <add>, %52, %cst_21 [1] : vector<8x32xf32> to vector<8xf32>
      %54 = vector.shape_cast %53 : vector<8xf32> to vector<8x1xf32>
      %cst_22 = arith.constant 9.99999996E-13 : f32
      %55 = vector.broadcast %cst_22 : f32 to vector<8x1xf32>
      %56 = arith.maximumf %54, %55 : vector<8x1xf32>
      %57 = math.rsqrt %56 : vector<8x1xf32>
      %58 = vector.broadcast %57 : vector<8x1xf32> to vector<8x32xf32>
      %59 = arith.mulf %51, %58 : vector<8x32xf32>
      %60 = arith.truncf %59 : vector<8x32xf32> to vector<8x32xbf16>
      %c0_23 = arith.constant 0 : index
      %c0_24 = arith.constant 0 : index
      %61 = vector.load %arg4[%c0_23, %c0_24] : memref<16x32xbf16, #tpu.memory_space<vmem>>, vector<8x32xbf16>
      tpu.vector_store %arg4[%c0_23, %c0_24], %60 {strides = array<i32>} : memref<16x32xbf16, #tpu.memory_space<vmem>>, vector<8x32xbf16>,
      %c0_25 = arith.constant 0 : index
      %c0_26 = arith.constant 0 : index
      %62 = vector.load %arg1[%c0_25, %c0_26] : memref<8x32xf32, #tpu.memory_space<vmem>>, vector<8x32xf32>
      %63 = arith.mulf %62, %62 : vector<8x32xf32>
      %cst_27 = arith.constant dense<0.000000e+00> : vector<8xf32>
      %64 = vector.multi_reduction <add>, %63, %cst_27 [1] : vector<8x32xf32> to vector<8xf32>
      %65 = vector.shape_cast %64 : vector<8xf32> to vector<8x1xf32>
      %cst_28 = arith.constant 9.99999996E-13 : f32
      %66 = vector.broadcast %cst_28 : f32 to vector<8x1xf32>
      %67 = arith.maximumf %65, %66 : vector<8x1xf32>
      %68 = math.rsqrt %67 : vector<8x1xf32>
      %69 = vector.broadcast %68 : vector<8x1xf32> to vector<8x32xf32>
      %70 = arith.mulf %62, %69 : vector<8x32xf32>
      %71 = arith.truncf %70 : vector<8x32xf32> to vector<8x32xbf16>
      %c8 = arith.constant 8 : index
      %c0_29 = arith.constant 0 : index
      %72 = vector.load %arg4[%c8, %c0_29] : memref<16x32xbf16, #tpu.memory_space<vmem>>, vector<8x32xbf16>
      tpu.vector_store %arg4[%c8, %c0_29], %71 {strides = array<i32>} : memref<16x32xbf16, #tpu.memory_space<vmem>>, vector<8x32xbf16>,
      %cst_30 = arith.constant 0.000000e+00 : f32
      %73 = vector.broadcast %cst_30 : f32 to vector<1x1xf32>
      %c0_31 = arith.constant 0 : index
      %c0_32 = arith.constant 0 : index
      %74 = vector.load %arg3[%c0_31, %c0_32] : memref<1x1xf32, #tpu.memory_space<vmem>>, vector<1x1xf32>
      tpu.vector_store %arg3[%c0_31, %c0_32], %73 {strides = array<i32>} : memref<1x1xf32, #tpu.memory_space<vmem>>, vector<1x1xf32>,
    } else {
    }
    %c8_i32 = arith.constant 8 : i32
    %3 = arith.muli %arg0, %c8_i32 : i32
    %4 = tpu.assume_multiple %3, 8 : i32
    %5 = arith.index_cast %4 : i32 to index
    %c0 = arith.constant 0 : index
    %6 = vector.load %arg1[%5, %c0] : memref<8x32xf32, #tpu.memory_space<vmem>>, vector<8x32xf32>
    %7 = arith.index_cast %4 : i32 to index
    %c0_1 = arith.constant 0 : index
    %8 = vector.load %arg2[%7, %c0_1] : memref<8x32xf32, #tpu.memory_space<vmem>>, vector<8x32xf32>
    %9 = arith.mulf %6, %6 : vector<8x32xf32>
    %cst = arith.constant dense<0.000000e+00> : vector<8xf32>
    %10 = vector.multi_reduction <add>, %9, %cst [1] : vector<8x32xf32> to vector<8xf32>
    %11 = vector.shape_cast %10 : vector<8xf32> to vector<8x1xf32>
    %12 = arith.mulf %8, %8 : vector<8x32xf32>
    %cst_2 = arith.constant dense<0.000000e+00> : vector<8xf32>
    %13 = vector.multi_reduction <add>, %12, %cst_2 [1] : vector<8x32xf32> to vector<8xf32>
    %14 = vector.shape_cast %13 : vector<8xf32> to vector<8x1xf32>
    %cst_3 = arith.constant 9.99999996E-13 : f32
    %15 = vector.broadcast %cst_3 : f32 to vector<8x1xf32>
    %16 = arith.maximumf %11, %15 : vector<8x1xf32>
    %17 = math.rsqrt %16 : vector<8x1xf32>
    %cst_4 = arith.constant 9.99999996E-13 : f32
    %18 = vector.broadcast %cst_4 : f32 to vector<8x1xf32>
    %19 = arith.maximumf %14, %18 : vector<8x1xf32>
    %20 = math.rsqrt %19 : vector<8x1xf32>
    %21 = arith.mulf %6, %8 : vector<8x32xf32>
    %cst_5 = arith.constant dense<0.000000e+00> : vector<8xf32>
    %22 = vector.multi_reduction <add>, %21, %cst_5 [1] : vector<8x32xf32> to vector<8xf32>
    %23 = vector.shape_cast %22 : vector<8xf32> to vector<8x1xf32>
    %24 = arith.mulf %23, %17 : vector<8x1xf32>
    %25 = arith.mulf %24, %20 : vector<8x1xf32>
    %26 = arith.mulf %11, %17 : vector<8x1xf32>
    %27 = arith.mulf %26, %17 : vector<8x1xf32>
    %28 = math.exp %25 : vector<8x1xf32>
    %29 = math.exp %27 : vector<8x1xf32>
    %30 = arith.addf %28, %29 : vector<8x1xf32>
    %c8_i32_6 = arith.constant 8 : i32
    %31 = arith.addi %c8_i32_6, %4 : i32
    %32 = arith.index_cast %31 : i32 to index
    %c0_7 = arith.constant 0 : index
    %33 = vector.load %arg4[%32, %c0_7] : memref<16x32xbf16, #tpu.memory_space<vmem>>, vector<8x32xbf16>
    %c0_8 = arith.constant 0 : index
    %c0_9 = arith.constant 0 : index
    %34 = vector.load %arg4[%c0_8, %c0_9] : memref<16x32xbf16, #tpu.memory_space<vmem>>, vector<16x32xbf16>
    %cst_10 = arith.constant dense<0.000000e+00> : vector<8x16xf32>
    %35 = tpu.matmul %33, %34, %cst_10 {dimension_numbers = #tpu.dot_dimension_numbers<[1], [1], [0], [0], [0, 0, 1, 0], [], []>} : vector<8x32xbf16>, vector<16x32xbf16>, vector<8x16xf32> -> vector<8x16xf32>
    %36 = math.exp %35 : vector<8x16xf32>
    %cst_11 = arith.constant dense<0.000000e+00> : vector<8xf32>
    %37 = vector.multi_reduction <add>, %36, %cst_11 [1] : vector<8x16xf32> to vector<8xf32>
    %38 = vector.shape_cast %37 : vector<8xf32> to vector<8x1xf32>
    %39 = arith.subf %38, %30 : vector<8x1xf32>
    %cst_12 = arith.constant 9.99999997E-7 : f32
    %40 = vector.broadcast %cst_12 : f32 to vector<8x1xf32>
    %41 = arith.addf %39, %40 : vector<8x1xf32>
    %42 = math.log %41 : vector<8x1xf32>
    %43 = arith.subf %42, %25 : vector<8x1xf32>
    %c0_13 = arith.constant 0 : index
    %c0_14 = arith.constant 0 : index
    %44 = vector.load %arg3[%c0_13, %c0_14] : memref<1x1xf32, #tpu.memory_space<vmem>>, vector<1x1xf32>
    %cst_15 = arith.constant dense<0.000000e+00> : vector<1xf32>
    %45 = vector.multi_reduction <add>, %43, %cst_15 [0] : vector<8x1xf32> to vector<1xf32>
    %46 = vector.shape_cast %45 : vector<1xf32> to vector<1x1xf32>
    %cst_16 = arith.constant 1.250000e-01 : f32
    %47 = vector.broadcast %cst_16 : f32 to vector<1x1xf32>
    %48 = arith.mulf %46, %47 : vector<1x1xf32>
    %49 = arith.addf %44, %48 : vector<1x1xf32>
    %c0_17 = arith.constant 0 : index
    %c0_18 = arith.constant 0 : index
    %50 = vector.load %arg3[%c0_17, %c0_18] : memref<1x1xf32, #tpu.memory_space<vmem>>, vector<1x1xf32>
    tpu.vector_store %arg3[%c0_17, %c0_18], %49 {strides = array<i32>} : memref<1x1xf32, #tpu.memory_space<vmem>>, vector<1x1xf32>,
    return
  }
  func.func @transform_0(%arg0: i32) -> (i32, i32) {
    %c0_i32 = arith.constant 0 : i32
    %c0_i32_0 = arith.constant 0 : i32
    %c0_i32_1 = arith.constant 0 : i32
    return %c0_i32, %c0_i32_0 : i32, i32
  }
  func.func @transform_1(%arg0: i32) -> (i32, i32) {
    %c0_i32 = arith.constant 0 : i32
    %c0_i32_0 = arith.constant 0 : i32
    %c0_i32_1 = arith.constant 0 : i32
    return %c0_i32, %c0_i32_0 : i32, i32
  }
  func.func @transform_2(%arg0: i32) -> (i32, i32) {
    %c0_i32 = arith.constant 0 : i32
    %c0_i32_0 = arith.constant 0 : i32
    %c0_i32_1 = arith.constant 0 : i32
    return %c0_i32, %c0_i32_0 : i32, i32
  }
}

</mosaic_0001>

<bundles_post_ra>
// kernel: tpu_custom_call.1
= control target key start
LH: loop header
LB: loop body
LE: loop exit
PB: predicated region body
PF: predicated region fallthrough
CT: control target
= control target key end

     0   :  { %7 = vsyncpa [#allocation4], 0  ;;  %s349_s0 = inlined_call_operand.hbm [shape: f32[8,32], index: 0, kind: input, shape index: {}]   ;;  %s350_s1 = inlined_call_operand.hbm [shape: f32[8,32], index: 1, kind: input, shape index: {}]   ;;  %s351_s2 = inlined_call_operand.hbm [shape: f32[1,1], index: 2, kind: output, shape index: {}]  }
   0x1   :  { %8 = vsyncpa [#allocation7], 0 }
   0x2   :  { %9 = vsyncpa [#allocation5], 0  ;;  %s15_s11 = sshll.u32 %s349_s0, 4  ;;  %s314_s12 = smov [#allocation3]   ;;  %s16_s11 = int_to_ptr.hbm [resolvable:$true] %s15_s11 }
   0x3   :  { %s17_s13 = sshll.u32 %s314_s12, 4  ;;  %s26_s16 = sshll.u32 %s350_s1, 4  ;;  %s18_s13 = int_to_ptr.vmem [resolvable:$true] %s17_s13  ;;  %s27_s16 = int_to_ptr.hbm [resolvable:$true] %s26_s16 }
   0x4   :  { %20 = dma.hbm_to_vmem [thread:$0]  %s16_s11, 128, %s18_s13, [#allocation4]  }
   0x5   :  { %s315_s17 = smov [#allocation6]  }
   0x6   :  { %s28_s18 = sshll.u32 %s315_s17, 4  ;;  %s29_s18 = int_to_ptr.vmem [resolvable:$true] %s28_s18 }
   0x7   :  { %31 = dma.hbm_to_vmem [thread:$0]  %s27_s16, 128, %s29_s18, [#allocation7]  }
   0x8   :  { %308 = dma.done.wait [#allocation4], 128  }
   0x9   :  { %309 = vsyncadd [#allocation4], 4294967168 }
   0xa   :  { %310 = dma.done.wait [#allocation7], 128  }
   0xb   :  { %311 = vsyncadd [#allocation7], 4294967168  ;;  %v45_v0 = vld [vmem:[#allocation6] sm:$0xff]  ;;  %vm47_vm0 = vcmask 261120   ;;  %v66_v1 = vld [vmem:[#allocation3] sm:$0xff]  ;;  %vm64_vm4 = vcmask 257024  }
   0xc   :  { %v46_v2 = vmul.f32 %v45_v0, %v45_v0  ;;  %v67_v3 = vmul.f32 %v66_v1, %v66_v1  ;;  %v123_v18 = vmul.f32 %v66_v1, %v45_v0  ;;  %vm170_vm8 = vcmask 130048   ;;  %s317_s0 = smov [#allocation8]   ;;  %s197_s21 = sshll.u32 %s351_s2, 4  ;;  %s198_s21 = int_to_ptr.hbm [resolvable:$true] %s197_s21 }
   0xd   :  { %vm85_vm15 = vcmask 0   ;;  %v316_v63 = vmov 0.0   ;;  %s195_s1 = sshll.u32 %s317_s0, 4  ;;  %s196_s1 = int_to_ptr.vmem [resolvable:$true] %s195_s1 }
   0xe   :  { %v48_v4 = vsel %vm47_vm0, %v46_v2, 0.0  ;;  %v68_v5 = vsel %vm47_vm0, %v67_v3, 0.0  ;;  %v124_v21 = vsel %vm47_vm0, %v123_v18, 0.0  ;;  %86 = vst.msk [vmem:[#allocation8] sm:$0x1] %vm85_vm15, %v316_v63 }
   0xf   :  { %49 = vadd.xlane.f32.xlu0 %v48_v4  ;;  %95 = vadd.xlane.f32.xlu1 %v68_v5 }
  0x10   :  { %125 = vadd.xlane.f32.xlu2 %v124_v21 }
  0x17   :  { %69 = vadd.xlane.f32.xlu0 %v68_v5  ;;  %99 = vadd.xlane.f32.xlu1 %v48_v4 }
  0x82   :  { %v50_v6 = vpop.xlane.xlu0 %49  ;;  %v96_v38 = vpop.xlane.xlu1 %95 }
  0x83   :  { %v51_v7 = vmax.f32 %v50_v6, 1e-12  ;;  %v101_v39 = vmax.f32 %v96_v38, 1e-12  ;;  %v126_v54 = vpop.xlane.xlu2 %125 }
  0x85   :  { %220 = vrsqrt.f32 %v51_v7  ;;  %vm58_vm2 = vweird.f32 %v51_v7  ;;  %vm108_vm9 = vweird.f32 %v101_v39 }
  0x8a   :  { %v70_v8 = vpop.xlane.xlu0 %69  ;;  %v100_v40 = vpop.xlane.xlu1 %99 }
  0x8b   :  { %v221_v9 = vpop.eup %220  ;;  %v71_v10 = vmax.f32 %v70_v8, 1e-12  ;;  %v112_v41 = vmax.f32 %v100_v40, 1e-12 }
  0x8c   :  { %v53_v11 = vmul.f32 %v221_v9, %v51_v7  ;;  %vm59_vm1 = vweird.f32 %v221_v9 }
  0x8d   :  { %222 = vrsqrt.f32 %v71_v10  ;;  %vm60_vm3 = vmor %vm58_vm2, %vm59_vm1  ;;  %vm78_vm6 = vweird.f32 %v71_v10  ;;  %vm119_vm12 = vweird.f32 %v112_v41 }
  0x8e   :  { %v54_v12 = vmul.f32 %v221_v9, %v53_v11 }
  0x90   :  { %v55_v13 = vmul.f32 0.5, %v54_v12 }
  0x92   :  { %v56_v14 = vsub.f32 1.5, %v55_v13 }
  0x93   :  { %v223_v15 = vpop.eup %222 }
  0x94   :  { %v57_v16 = vmul.f32 %v221_v9, %v56_v14  ;;  %v73_v17 = vmul.f32 %v223_v15, %v71_v10  ;;  %vm79_vm5 = vweird.f32 %v223_v15 }
  0x95   :  { %vm80_vm7 = vmor %vm78_vm6, %vm79_vm5 }
  0x96   :  { %v61_v19 = vsel %vm60_vm3, %v221_v9, %v57_v16  ;;  %v74_v20 = vmul.f32 %v223_v15, %v73_v17 }
  0x97   :  { %v62_v22 = vmul.f32 %v61_v19, %v45_v0 }
  0x98   :  { %v75_v23 = vmul.f32 0.5, %v74_v20 }
  0x99   :  { %v63_v24 = vpack.c.bf16 %v62_v22, %v62_v22 }
  0x9a   :  { %v76_v25 = vsub.f32 1.5, %v75_v23 }
  0x9b   :  { %65 = vst.msk [vmem:[#allocation2] sm:$0xf] %vm64_vm4, %v63_v24 }
  0x9c   :  { %v77_v26 = vmul.f32 %v223_v15, %v76_v25 }
  0x9e   :  { %v81_v27 = vsel %vm80_vm7, %v223_v15, %v77_v26  ;;  %v179_v15 = vld [vmem:[#allocation8] sm:$0x1] }
  0x9f   :  { %v82_v28 = vmul.f32 %v81_v27, %v66_v1 }
  0xa1   :  { %v83_v29 = vpack.c.bf16 %v82_v28, %v82_v28 }
  0xa3   :  { %84 = vst.msk [vmem:[#allocation2 + $0x4] sm:$0xf] %vm64_vm4, %v83_v29 }
  0xaa   :  { %v215_v30 = vld [vmem:[#allocation2] sm:$0xff] }
  0xab   :  { %v153_v31 = vsel %vm47_vm0, %v215_v30, 0  ;;  %v141_v32 = vld [vmem:[#allocation2 + $0x4] sm:$0xf] }
  0xac   :  { %162 = vmatpush.bf16.xpose.msra.mxu0 %v153_v31 }
  0xb3   :  { %214 = vmatmul.msk.bf16.vlgmr.msra.gmra.mxu0 %vm47_vm0, %v141_v32 }
 0x130   :  { %v164_v33 = vpop.f32.mrf.mxu0 }
 0x131   :  { %v168_v34 = vmul.f32 1.442695, %v164_v33 }
 0x133   :  { %224 = vpow2.f32 %v168_v34 }
 0x134   :  { %226 = vrsqrt.f32 %v101_v39 }
 0x135   :  { %228 = vrsqrt.f32 %v112_v41 }
 0x138   :  { %v166_v35 = vpop.f32.mrf.mxu0 }
 0x139   :  { %v225_v36 = vpop.eup %224 }
 0x13a   :  { %v171_v37 = vsel %vm170_vm8, %v225_v36, 0.0  ;;  %v227_v42 = vpop.eup %226 }
 0x13b   :  { %172 = vadd.xlane.f32.xlu2 %v171_v37  ;;  %v103_v43 = vmul.f32 %v227_v42, %v101_v39  ;;  %v229_v44 = vpop.eup %228  ;;  %vm109_vm10 = vweird.f32 %v227_v42 }
 0x13c   :  { %v114_v46 = vmul.f32 %v229_v44, %v112_v41  ;;  %vm110_vm11 = vmor %vm108_vm9, %vm109_vm10  ;;  %vm120_vm13 = vweird.f32 %v229_v44 }
 0x13d   :  { %v104_v45 = vmul.f32 %v227_v42, %v103_v43  ;;  %vm121_vm14 = vmor %vm119_vm12, %vm120_vm13 }
 0x13e   :  { %v115_v48 = vmul.f32 %v229_v44, %v114_v46 }
 0x13f   :  { %v105_v47 = vmul.f32 0.5, %v104_v45 }
 0x140   :  { %v116_v50 = vmul.f32 0.5, %v115_v48 }
 0x141   :  { %v106_v49 = vsub.f32 1.5, %v105_v47 }
 0x142   :  { %v117_v52 = vsub.f32 1.5, %v116_v50 }
 0x143   :  { %v107_v51 = vmul.f32 %v227_v42, %v106_v49 }
 0x144   :  { %v118_v55 = vmul.f32 %v229_v44, %v117_v52 }
 0x145   :  { %v111_v53 = vsel %vm110_vm11, %v227_v42, %v107_v51 }
 0x146   :  { %v129_v56 = vmul.f32 %v111_v53, %v96_v38  ;;  %v127_v57 = vmul.f32 %v126_v54, %v111_v53  ;;  %v122_v58 = vsel %vm121_vm14, %v229_v44, %v118_v55 }
 0x148   :  { %v130_v59 = vmul.f32 %v129_v56, %v111_v53  ;;  %v128_v60 = vmul.f32 %v127_v57, %v122_v58 }
 0x14a   :  { %v133_v61 = vmul.f32 1.442695, %v130_v59  ;;  %v131_v62 = vmul.f32 1.442695, %v128_v60 }
 0x14c   :  { %230 = vpow2.f32 %v133_v61 }
 0x14d   :  { %232 = vpow2.f32 %v131_v62 }
 0x152   :  { %v231_v0 = vpop.eup %230 }
 0x153   :  { %v233_v1 = vpop.eup %232 }
 0x154   :  { %v135_v2 = vadd.f32 %v233_v1, %v231_v0 }
 0x1ae   :  { %v173_v3 = vpop.xlane.xlu2 %172 }
 0x1af   :  { %v174_v4 = vsub.f32 %v173_v3, %v135_v2 }
 0x1b1   :  { %v175_v5 = vadd.f32 1e-06, %v174_v4 }
 0x1b3   :  { %234 = vlog2.f32 %v175_v5 }
 0x1b9   :  { %v235_v6 = vpop.eup %234 }
 0x1ba   :  { %v177_v7 = vmul.f32 0.6931472, %v235_v6 }
 0x1bc   :  { %v178_v8 = vsub.f32 %v177_v7, %v128_v60 }
 0x1be   :  { %v180_v9 = vrot.slane %v178_v8, 4 }
 0x1c0   :  { %v181_v10 = vadd.f32 %v180_v9, %v178_v8 }
 0x1c2   :  { %v182_v11 = vrot.slane %v181_v10, 2 }
 0x1c4   :  { %v183_v12 = vadd.f32 %v182_v11, %v181_v10 }
 0x1c6   :  { %v184_v13 = vrot.slane %v183_v12, 1 }
 0x1c8   :  { %v185_v14 = vadd.f32 %v184_v13, %v183_v12 }
 0x1ca   :  { %v186_v16 = vmul.f32 0.125, %v185_v14 }
 0x1cc   :  { %v187_v17 = vadd.f32 %v186_v16, %v179_v15 }
 0x1ce   :  { %189 = vst.msk [vmem:[#allocation8] sm:$0x1] %vm85_vm15, %v187_v17 }
 0x1cf   :  { %200 = dma.vmem_to_hbm [thread:$0]  %s196_s1, 16, %s198_s21, [#allocation5]  }
 0x1d0   :  { %312 = dma.done.wait [#allocation5], 16  }
 0x1d1   :  { %313 = vsyncadd [#allocation5], 4294967280 }
 0x1d2   :  { %205 = vsyncpa [#allocation4], 1 }
 0x1d3   :  { %206 = vsyncpa [#allocation7], 1 }
 0x1d4   :  { %207 = vsyncpa [#allocation5], 1 }

</bundles_post_ra>
